<compile_context>
chip_gen: v7x
topology: tpu7x:2x2x1
jax: 0.10.0
libtpu: 0.0.40
codegen_flags: <defaults>
</compile_context>

<pallas_src>
import functools

import jax
import jax.numpy as jnp
from jax.experimental import pallas as pl
from jax.experimental.pallas import tpu as pltpu


def _singlenet_kernel(M, E, edges_ref, w_ref, b_ref, out_ref):
    # edges_ref: (TB, E) int32 in VMEM
    # w_ref:     (1, N)  f32  in VMEM (replicated across the batch grid)
    # b_ref:     (1, 1)  f32  in SMEM
    # out_ref:   (TB, 1) f32  in VMEM
    TB = edges_ref.shape[0]
    N = w_ref.shape[1]

    edges = edges_ref[...]                                 # (TB, E) int32
    # Small (1, N) iota; compares broadcast it across sublanes instead of
    # materializing a (TB, N) int32 constant plane.
    col = jax.lax.broadcasted_iota(jnp.int32, (1, N), 1)   # (1, N)

    w = w_ref[...]                                         # (1, N)
    neg_w = -w                                             # hoisted once

    # Build scatter masks. E is small (static); the Python unroll is fine.
    # TODO(synk): for large E switch to lax.fori_loop(..., unroll=True) and a
    # gather/segment formulation when N >> E to drop the O(B*N*E) compares.
    mask_a = jnp.zeros((TB, N), dtype=jnp.bool_)
    for j in range(M):
        mask_a = jnp.logical_or(mask_a, col == edges[:, j:j + 1])
    mask_b = jnp.zeros((TB, N), dtype=jnp.bool_)
    for j in range(M, E):
        mask_b = jnp.logical_or(mask_b, col == edges[:, j:j + 1])

    # Fused select: -w where the -1 scatter wrote (wins on collisions),
    # +w where only the +1 scatter wrote, 0 elsewhere.  No dense `single`
    # plane and no extra elementwise multiply.
    contrib = jnp.where(mask_b, neg_w,
                        jnp.where(mask_a, w, jnp.float32(0.0)))   # (TB, N)

    # Linear(N -> 1): lane reduction (XLU) + bias, then sigmoid on the EUP.
    logit = jnp.sum(contrib, axis=-1, keepdims=True) + b_ref[0, 0]  # (TB, 1)
    out_ref[...] = jax.nn.sigmoid(logit)


def singlenet_forward(edges, weight, bias, *, M, block_b=512):
    """edges: (B, E) int32, weight: (1, N) f32, bias: (1, 1) f32 -> (B, 1) f32."""
    B, E = edges.shape
    N = weight.shape[1]

    TB = min(block_b, B)
    pad = (-B) % TB
    if pad:
        # Padded rows compute garbage logits but are sliced off below.
        edges = jnp.pad(edges, ((0, pad), (0, 0)))
    Bp = B + pad

    kernel = functools.partial(_singlenet_kernel, M, E)
    out = pl.pallas_call(
        kernel,
        out_shape=jax.ShapeDtypeStruct((Bp, 1), jnp.float32),
        grid_spec=pltpu.PrefetchScalarGridSpec(
            num_scalar_prefetch=0,
            grid=(Bp // TB,),
            in_specs=[
                pl.BlockSpec((TB, E), lambda i: (i, 0)),   # tiled over batch
                pl.BlockSpec((1, N), lambda i: (0, 0)),    # replicated weight
                pl.BlockSpec(memory_space=pltpu.SMEM),     # scalar bias
            ],
            out_specs=pl.BlockSpec((TB, 1), lambda i: (i, 0)),
        ),
        compiler_params=pltpu.CompilerParams(
            # Batch tiles are independent -> shard across TCs on v7x megacore.
            dimension_semantics=("parallel",),
        ),
    )(edges, weight, bias)
    return out[:B] if pad else out


def reference_forward(edges, weight, bias, *, M):
    """Pure-JAX reference mirroring the PyTorch scatter semantics."""
    B, E = edges.shape
    N = weight.shape[1]
    col = jnp.arange(N)[None, :]
    mask_a = jnp.any(edges[:, :M, None] == col[:, None, :], axis=1)
    mask_b = jnp.any(edges[:, M:, None] == col[:, None, :], axis=1)
    single = jnp.where(mask_b, -1.0, jnp.where(mask_a, 1.0, 0.0)).astype(jnp.float32)
    logit = single @ weight.T + bias[0, 0]
    return jax.nn.sigmoid(logit)


if __name__ == "__main__":
    # Small shapes consistent with the module (depth T is unused in forward).
    B = 16         # number of edge rows (batch)
    N = 128        # number of nodes (Linear in-features)
    M = 4          # first M columns scatter +1, the rest scatter -1
    E = 2 * M      # total edge columns
    TB = 8         # small batch tile so the grid (2 steps) is exercised

    key = jax.random.PRNGKey(0)
    k_edges, k_w, k_b = jax.random.split(key, 3)

    edges = jax.random.randint(k_edges, (B, E), 0, N, dtype=jnp.int32)
    # Deterministic nn.Linear-style init: U(-1/sqrt(N), 1/sqrt(N)).
    bound = 1.0 / (N ** 0.5)
    weight = jax.random.uniform(k_w, (1, N), jnp.float32, -bound, bound)
    bias = jax.random.uniform(k_b, (1, 1), jnp.float32, -bound, bound)

    out = singlenet_forward(edges, weight, bias, M=M, block_b=TB)
    out = jax.block_until_ready(out)

    ref = reference_forward(edges, weight, bias, M=M)
    assert out.shape == (B, 1)
    assert jnp.allclose(out, ref, atol=1e-6), (out, ref)

    print("KERNEL_OK")
</pallas_src>

<mosaic_0001>
module attributes {stable_mosaic.version = 11 : i64} {
  func.func @_singlenet_kernel(%arg0: i32, %arg1: memref<8x8xi32, #tpu.memory_space<vmem>>, %arg2: memref<1x128xf32, #tpu.memory_space<vmem>>, %arg3: memref<1x1xf32, #tpu.memory_space<smem>>, %arg4: memref<8x1xf32, #tpu.memory_space<vmem>>) attributes {dimension_semantics = [#tpu.dimension_semantics<parallel>], iteration_bounds = array<i64: 2>, scalar_prefetch = 0 : i64, scratch_operands = 0 : i64, tpu.core_type = #tpu.core_type<tc>, window_params = [{transform_indices = @transform_0, window_bounds = array<i64: 8, 8>}, {pipeline_mode = #tpu.pipeline_mode<synchronous>, transform_indices = @transform_1, window_bounds = array<i64: 1, 128>}, {transform_indices = @transform_2, window_bounds = array<i64: 1, 1>}, {transform_indices = @transform_3, window_bounds = array<i64: 8, 1>}]} {
    %c0 = arith.constant 0 : index
    %c0_0 = arith.constant 0 : index
    %0 = vector.load %arg1[%c0, %c0_0] : memref<8x8xi32, #tpu.memory_space<vmem>>, vector<8x8xi32>
    %1 = tpu.iota {dimensions = array<i32: 1>} : vector<1x128xi32>
    %c0_1 = arith.constant 0 : index
    %c0_2 = arith.constant 0 : index
    %2 = vector.load %arg2[%c0_1, %c0_2] : memref<1x128xf32, #tpu.memory_space<vmem>>, vector<1x128xf32>
    %cst = arith.constant 0.000000e+00 : f32
    %3 = vector.broadcast %cst : f32 to vector<1x128xf32>
    %4 = arith.subf %3, %2 : vector<1x128xf32>
    %false = arith.constant false
    %5 = vector.broadcast %false : i1 to vector<8x128xi1>
    %6 = vector.extract_strided_slice %0 {offsets = [0, 0], sizes = [8, 1], strides = [1, 1]} : vector<8x8xi32> to vector<8x1xi32>
    %7 = vector.broadcast %1 : vector<1x128xi32> to vector<8x128xi32>
    %8 = vector.broadcast %6 : vector<8x1xi32> to vector<8x128xi32>
    %9 = arith.cmpi eq, %7, %8 : vector<8x128xi32>
    %10 = arith.ori %5, %9 : vector<8x128xi1>
    %11 = vector.extract_strided_slice %0 {offsets = [0, 1], sizes = [8, 1], strides = [1, 1]} : vector<8x8xi32> to vector<8x1xi32>
    %12 = vector.broadcast %1 : vector<1x128xi32> to vector<8x128xi32>
    %13 = vector.broadcast %11 : vector<8x1xi32> to vector<8x128xi32>
    %14 = arith.cmpi eq, %12, %13 : vector<8x128xi32>
    %15 = arith.ori %10, %14 : vector<8x128xi1>
    %16 = vector.extract_strided_slice %0 {offsets = [0, 2], sizes = [8, 1], strides = [1, 1]} : vector<8x8xi32> to vector<8x1xi32>
    %17 = vector.broadcast %1 : vector<1x128xi32> to vector<8x128xi32>
    %18 = vector.broadcast %16 : vector<8x1xi32> to vector<8x128xi32>
    %19 = arith.cmpi eq, %17, %18 : vector<8x128xi32>
    %20 = arith.ori %15, %19 : vector<8x128xi1>
    %21 = vector.extract_strided_slice %0 {offsets = [0, 3], sizes = [8, 1], strides = [1, 1]} : vector<8x8xi32> to vector<8x1xi32>
    %22 = vector.broadcast %1 : vector<1x128xi32> to vector<8x128xi32>
    %23 = vector.broadcast %21 : vector<8x1xi32> to vector<8x128xi32>
    %24 = arith.cmpi eq, %22, %23 : vector<8x128xi32>
    %25 = arith.ori %20, %24 : vector<8x128xi1>
    %false_3 = arith.constant false
    %26 = vector.broadcast %false_3 : i1 to vector<8x128xi1>
    %27 = vector.extract_strided_slice %0 {offsets = [0, 4], sizes = [8, 1], strides = [1, 1]} : vector<8x8xi32> to vector<8x1xi32>
    %28 = vector.broadcast %1 : vector<1x128xi32> to vector<8x128xi32>
    %29 = vector.broadcast %27 : vector<8x1xi32> to vector<8x128xi32>
    %30 = arith.cmpi eq, %28, %29 : vector<8x128xi32>
    %31 = arith.ori %26, %30 : vector<8x128xi1>
    %32 = vector.extract_strided_slice %0 {offsets = [0, 5], sizes = [8, 1], strides = [1, 1]} : vector<8x8xi32> to vector<8x1xi32>
    %33 = vector.broadcast %1 : vector<1x128xi32> to vector<8x128xi32>
    %34 = vector.broadcast %32 : vector<8x1xi32> to vector<8x128xi32>
    %35 = arith.cmpi eq, %33, %34 : vector<8x128xi32>
    %36 = arith.ori %31, %35 : vector<8x128xi1>
    %37 = vector.extract_strided_slice %0 {offsets = [0, 6], sizes = [8, 1], strides = [1, 1]} : vector<8x8xi32> to vector<8x1xi32>
    %38 = vector.broadcast %1 : vector<1x128xi32> to vector<8x128xi32>
    %39 = vector.broadcast %37 : vector<8x1xi32> to vector<8x128xi32>
    %40 = arith.cmpi eq, %38, %39 : vector<8x128xi32>
    %41 = arith.ori %36, %40 : vector<8x128xi1>
    %42 = vector.extract_strided_slice %0 {offsets = [0, 7], sizes = [8, 1], strides = [1, 1]} : vector<8x8xi32> to vector<8x1xi32>
    %43 = vector.broadcast %1 : vector<1x128xi32> to vector<8x128xi32>
    %44 = vector.broadcast %42 : vector<8x1xi32> to vector<8x128xi32>
    %45 = arith.cmpi eq, %43, %44 : vector<8x128xi32>
    %46 = arith.ori %41, %45 : vector<8x128xi1>
    %cst_4 = arith.constant 0.000000e+00 : f32
    %47 = vector.shape_cast %2 : vector<1x128xf32> to vector<1x128xf32>
    %48 = vector.broadcast %47 : vector<1x128xf32> to vector<8x128xf32>
    %49 = vector.broadcast %cst_4 : f32 to vector<8x128xf32>
    %50 = arith.select %25, %48, %49 : vector<8x128xi1>, vector<8x128xf32>
    %51 = vector.shape_cast %4 : vector<1x128xf32> to vector<1x128xf32>
    %52 = vector.broadcast %51 : vector<1x128xf32> to vector<8x128xf32>
    %53 = arith.select %46, %52, %50 : vector<8x128xi1>, vector<8x128xf32>
    %cst_5 = arith.constant dense<0.000000e+00> : vector<8xf32>
    %54 = vector.multi_reduction <add>, %53, %cst_5 [1] : vector<8x128xf32> to vector<8xf32>
    %55 = vector.shape_cast %54 : vector<8xf32> to vector<8x1xf32>
    %c0_6 = arith.constant 0 : index
    %c0_7 = arith.constant 0 : index
    %56 = memref.load %arg3[%c0_6, %c0_7] : memref<1x1xf32, #tpu.memory_space<smem>>
    %57 = vector.broadcast %56 : f32 to vector<8x1xf32>
    %58 = arith.addf %55, %57 : vector<8x1xf32>
    %59 = arith.negf %58 : vector<8x1xf32>
    %60 = math.exp %59 : vector<8x1xf32>
    %cst_8 = arith.constant 1.000000e+00 : f32
    %61 = vector.broadcast %cst_8 : f32 to vector<8x1xf32>
    %62 = arith.addf %61, %60 : vector<8x1xf32>
    %63 = arith.divf %61, %62 : vector<8x1xf32>
    %c0_9 = arith.constant 0 : index
    %c0_10 = arith.constant 0 : index
    %64 = vector.load %arg4[%c0_9, %c0_10] : memref<8x1xf32, #tpu.memory_space<vmem>>, vector<8x1xf32>
    tpu.vector_store %arg4[%c0_9, %c0_10], %63 {strides = array<i32>} : memref<8x1xf32, #tpu.memory_space<vmem>>, vector<8x1xf32>,
    return
  }
  func.func @transform_0(%arg0: i32) -> (i32, i32) {
    %c0_i32 = arith.constant 0 : i32
    %c0_i32_0 = arith.constant 0 : i32
    return %arg0, %c0_i32 : i32, i32
  }
  func.func @transform_1(%arg0: i32) -> (i32, i32) {
    %c0_i32 = arith.constant 0 : i32
    %c0_i32_0 = arith.constant 0 : i32
    %c0_i32_1 = arith.constant 0 : i32
    return %c0_i32, %c0_i32_0 : i32, i32
  }
  func.func @transform_2(%arg0: i32) -> (i32, i32) {
    %c0_i32 = arith.constant 0 : i32
    %c0_i32_0 = arith.constant 0 : i32
    %c0_i32_1 = arith.constant 0 : i32
    return %c0_i32, %c0_i32_0 : i32, i32
  }
  func.func @transform_3(%arg0: i32) -> (i32, i32) {
    %c0_i32 = arith.constant 0 : i32
    %c0_i32_0 = arith.constant 0 : i32
    return %arg0, %c0_i32 : i32, i32
  }
}

</mosaic_0001>

<bundles_post_ra>
// kernel: tpu_custom_call.1
= control target key start
LH: loop header
LB: loop body
LE: loop exit
PB: predicated region body
PF: predicated region fallthrough
CT: control target
= control target key end

     0   :  { %s368_s14 = smov 0   ;;  %s395_s0 = inlined_call_operand.vmem [shape: s32[16,8], index: 0, kind: input, shape index: {}]   ;;  %s396_s1 = inlined_call_operand.vmem [shape: f32[1,128], index: 1, kind: input, shape index: {}]   ;;  %s397_s2 = inlined_call_operand.<no memory space> [shape: f32[1,1], index: 2, kind: input, shape index: {}]   ;;  %s398_s3 = inlined_call_operand.vmem [shape: f32[16,1], index: 3, kind: output, shape index: {}]  }
   0x1   :  { %8 = sst [smem:[#allocation2]] %s397_s2 }
   0x2 LB: > { %s290_s15 = sadd.s32 4294967295, %s335_s14   ;;  %p294_p0 = scmp.ge.s32.totalorder %s335_s14, 1  ;;  %s335_s14 = sphi %s368_s14, %s14_s14  }
   0x3   : > { %p137_p1 = scmp.lt.s32.totalorder %s335_s14, 3 }
   0x5   : > { %p138_p2 = pnand %p294_p0, %p137_p1 }
   0x6   : > { %p159_p3 = scmp.lt.s32.totalorder (!%p138_p2), %s290_s15, 1  ;;  %v337_v0 = vmov (!%p138_p2), 2   ;;  %v338_v1 = vmov (!%p138_p2), 0   ;;  %v339_v3 = vmov (!%p138_p2), 4   ;;  %v340_v4 = vmov (!%p138_p2), 1   ;;  %s226_s21 = sld [smem:[#allocation2]] (!%p138_p2) }
   0x7   : > { %141 = sbr.rel (%p138_p2) target bundleno = 340 (0x154), region = 32  ;;  %318 = vset.pattern.permute.xlu1 (!%p138_p2), %v337_v0  ;;  %316 = vset.pattern.permute.xlu0 (!%p138_p2), %v338_v1  ;;  %v341_v5 = vmov (!%p138_p2), 5   ;;  %v342_v6 = vmov (!%p138_p2), 3   ;;  %v343_v7 = vmov (!%p138_p2), 6   ;;  %v344_v8 = vmov (!%p138_p2), 7  }
   0x8   : > { %v168_v12 = vlaneseq (!%p138_p2)  ;;  %v170_v18 = vld [vmem:[%s396_s1] sm:$0x1] (!%p138_p2)  ;;  %vm235_vm14 = vcmask (!%p138_p2), 7168  }
   0x9   : > { %v171_v20 = vsub.f32 (!%p138_p2), 0.0, %v170_v18 }
   0xa   : > { %v169_v14 = vand.u32 (!%p138_p2), 127, %v168_v12  ;;  %v212_v16 = vshrl.u32 (!%p138_p2), %v168_v12, 7 }
   0xc   : > { %v213_v19 = vsub.s32 (!%p138_p2), 0, %v212_v16  ;;  %v227_v27 = vstv (!%p138_p2), %s226_s21 }
   0xe   : > { %s400_s15 = smov (!%p159_p3, %s290_s15), 1  ;;  %v214_v22 = vrot.slane %v170_v18, %v213_v19  ;;  %v221_v23 = vrot.slane %v171_v20, %v213_v19 }
   0xf   : > { %s295_s2 = sshll.u32 %s400_s15, 3 }
  0x10   : > { %s162_s18 = scalar_lea.vmem %s395_s0, %s295_s2  ;;  %s166_s24 = scalar_lea.vmem %s398_s3, %s295_s2 }
  0x11   : > { %v167_v2 = vld [vmem:[%s162_s18] sm:$0xff] }
  0x12   : > { %182 = vperm.xlu1 %318, %v167_v2   ;;  %173 = vperm.xlu0 %316, %v167_v2  }
  0x16   : > { %319 = vset.pattern.permute.xlu1 %v339_v3  ;;  %317 = vset.pattern.permute.xlu0 %v340_v4 }
  0x17   : > { %192 = vperm.xlu1 %319, %v167_v2   ;;  %177 = vperm.xlu0 %317, %v167_v2  }
  0x1b   : > { %320 = vset.pattern.permute.xlu1 %v341_v5  ;;  %321 = vset.pattern.permute.xlu0 %v342_v6 }
  0x1c   : > { %196 = vperm.xlu1 %320, %v167_v2   ;;  %187 = vperm.xlu0 %321, %v167_v2  }
  0x20   : > { %322 = vset.pattern.permute.xlu1 %v343_v7  ;;  %324 = vset.pattern.permute.xlu0 %v344_v8 }
  0x21   : > { %201 = vperm.xlu1 %322, %v167_v2  }
  0x25   : > { %323 = vset.pattern.permute.xlu1 %v344_v8 }
  0x26   : > { %206 = vperm.xlu1 %323, %v167_v2  }
  0x91   : > { %v183_v9 = vpop.permute.xlu1 %182  ;;  %v174_v10 = vpop.permute.xlu0 %173 }
  0x92   : > { %vm175_vm0 = vcmp.eq.s32.totalorder %v169_v14, %v174_v10  ;;  %vm184_vm4 = vcmp.eq.s32.totalorder %v169_v14, %v183_v9 }
  0x96   : > { %v193_v11 = vpop.permute.xlu1 %192  ;;  %v178_v13 = vpop.permute.xlu0 %177 }
  0x97   : > { %vm179_vm1 = vcmp.eq.s32.totalorder %v169_v14, %v178_v13  ;;  %vm194_vm8 = vcmp.eq.s32.totalorder %v169_v14, %v193_v11 }
  0x98   : > { %vm180_vm2 = vmor %vm175_vm0, %vm179_vm1 }
  0x99   : > { %vm185_vm6 = vmor %vm180_vm2, %vm184_vm4 }
  0x9b   : > { %v197_v15 = vpop.permute.xlu1 %196  ;;  %v188_v17 = vpop.permute.xlu0 %187 }
  0x9c   : > { %vm189_vm3 = vcmp.eq.s32.totalorder %v169_v14, %v188_v17  ;;  %vm198_vm5 = vcmp.eq.s32.totalorder %v169_v14, %v197_v15 }
  0x9d   : > { %vm190_vm9 = vmor %vm185_vm6, %vm189_vm3 }
  0x9e   : > { %vm199_vm10 = vmor %vm194_vm8, %vm198_vm5  ;;  %v216_v25 = vsel %vm190_vm9, %v214_v22, 0.0 }
  0xa0   : > { %v202_v21 = vpop.permute.xlu1 %201 }
  0xa1   : > { %vm203_vm7 = vcmp.eq.s32.totalorder %v169_v14, %v202_v21 }
  0xa2   : > { %vm204_vm11 = vmor %vm199_vm10, %vm203_vm7 }
  0xa5   : > { %v207_v24 = vpop.permute.xlu1 %206 }
  0xa6   : > { %vm208_vm12 = vcmp.eq.s32.totalorder %v169_v14, %v207_v24 }
  0xa7   : > { %vm209_vm13 = vmor %vm204_vm11, %vm208_vm12 }
  0xa8   : > { %v223_v26 = vsel %vm209_vm13, %v221_v23, %v216_v25 }
  0xa9   : > { %224 = vadd.xlane.f32.xlu0 %v223_v26 }
 0x136   : > { %v225_v28 = vpop.xlane.xlu0 %224 }
 0x137   : > { %v228_v29 = vadd.f32 %v227_v27, %v225_v28 }
 0x139   : > { %v297_v30 = vmul.f32 -1.442695, %v228_v29 }
 0x13b   : > { %325 = vpow2.f32 %v297_v30 }
 0x145   : > { %v326_v31 = vpop.eup %325 }
 0x146   : > { %v232_v32 = vadd.f32 1.0, %v326_v31 }
 0x148   : > { %327 = vrcp.f32 %v232_v32 }
 0x152   : > { %v328_v33 = vpop.eup %327 }
 0x153   : > { %236 = vst.msk [vmem:[%s166_s24] sm:$0xff] %vm235_vm14, %v328_v33 }
 0x154 PF: > { %s14_s14 = sadd.s32 1, %s335_s14  }
 0x155   : > { %p11_p4 = scmp.ge.s32.totalorder %s14_s14, 4  }
 0x157   :  { %13 = sbr.rel (!%p11_p4) target bundleno = 2 (0x2), region = 62 }

</bundles_post_ra>
